<compile_context>
chip_gen: v5e
topology: v5e:2x2
jax: 0.10.0
libtpu: 0.0.40
codegen_flags: <defaults>
</compile_context>

<pallas_src>
import math
import functools

import jax
import jax.numpy as jnp
from jax.experimental import pallas as pl
from jax.experimental.pallas import tpu as pltpu

EPS = 1e-5  # nn.LayerNorm default eps


# ----------------------------- kernel helpers -------------------------------

def _layer_norm(v, g, b):
    mu = jnp.mean(v, axis=-1, keepdims=True)
    var = jnp.mean(jnp.square(v - mu), axis=-1, keepdims=True)
    return (v - mu) * jax.lax.rsqrt(var + EPS) * g + b


# --------------------------------- kernel -----------------------------------

def fused_encoder_kernel(x_ref, pos_ref,
                         ln0_g_ref, ln0_b_ref, wqkv_ref, bqkv_ref,
                         wo_ref, bo_ref, ln1_g_ref, ln1_b_ref,
                         w1_ref, b1_ref, w2_ref, b2_ref,
                         fln_g_ref, fln_b_ref,
                         o_ref, acc_ref,
                         *, num_heads, embed_scale):
    # Grid: (batch_tile b, layer l).  acc_ref carries the activation over l.
    l = pl.program_id(1)
    Bt, S, E = acc_ref.shape
    N = Bt * S
    H = num_heads
    D = E // H

    # ---- l == 0: embedding = sqrt(E) * x + sinusoidal positional embedding --
    @pl.when(l == 0)
    def _():
        acc_ref[...] = (x_ref[...].astype(jnp.float32) * embed_scale
                        + pos_ref[...])

    x = acc_ref[...]                                       # (Bt, S, E) f32

    # -------- pre-LN multi-head self-attention + residual ---------------------
    residual = x
    xn = _layer_norm(x, ln0_g_ref[0], ln0_b_ref[0])

    # fused QKV projection: one (Bt*S, E) x (E, 3E) bf16 MXU pass (f32 accum).
    # Attention scaling is already folded into the Q columns of wqkv/bqkv.
    qkv = jnp.dot(xn.reshape(N, E).astype(jnp.bfloat16), wqkv_ref[0],
                  preferred_element_type=jnp.float32) + bqkv_ref[0]   # (N, 3E)
    q = qkv[:, :E].reshape(Bt, S, E)
    k = qkv[:, E:2 * E].reshape(Bt, S, E)
    v = qkv[:, 2 * E:].reshape(Bt, S, E)

    # head-batched layout: (H*Bt, S, D)
    # TODO(synk): replace the per-head slice+stack with a single
    # reshape/einshape relayout once that lowering is proven for sub-128 D.
    def to_heads(t):
        th = jnp.stack([t[:, :, h * D:(h + 1) * D] for h in range(H)], axis=0)
        return th.reshape(H * Bt, S, D).astype(jnp.bfloat16)

    qh, kh, vh = to_heads(q), to_heads(k), to_heads(v)

    s = jnp.einsum('bqd,bkd->bqk', qh, kh,
                   preferred_element_type=jnp.float32)               # (H*Bt,S,S)
    s = s - jnp.max(s, axis=-1, keepdims=True)
    p = jnp.exp(s)
    denom = jnp.sum(p, axis=-1, keepdims=True)
    p = p * pl.reciprocal(denom, approx=True)        # EUP reciprocal, then mul
    ctx = jnp.einsum('bqk,bkd->bqd', p.astype(jnp.bfloat16), vh,
                     preferred_element_type=jnp.float32)             # (H*Bt,S,D)

    ctx = ctx.reshape(H, Bt, S, D)
    attn = jnp.concatenate([ctx[h] for h in range(H)], axis=-1)      # (Bt,S,E)
    attn = jnp.dot(attn.reshape(N, E).astype(jnp.bfloat16), wo_ref[0],
                   preferred_element_type=jnp.float32) + bo_ref[0]
    x = residual + attn.reshape(Bt, S, E)

    # -------- pre-LN feed-forward (ReLU) + residual ---------------------------
    # TODO(synk): for large E, tile the 4E hidden dim into lane chunks so the
    # (N, 4E) intermediate stays inside v7x's 64 MiB VMEM.
    residual = x
    xn = _layer_norm(x, ln1_g_ref[0], ln1_b_ref[0])
    h1 = jnp.dot(xn.reshape(N, E).astype(jnp.bfloat16), w1_ref[0],
                 preferred_element_type=jnp.float32) + b1_ref[0]
    h1 = jnp.maximum(h1, 0.0)
    h2 = jnp.dot(h1.astype(jnp.bfloat16), w2_ref[0],
                 preferred_element_type=jnp.float32) + b2_ref[0]
    x = residual + h2.reshape(Bt, S, E)

    acc_ref[...] = x                              # carry to layer l+1

    # ---- l == L-1: final LayerNorm (self.normalize == True) + store ----------
    @pl.when(l == pl.num_programs(1) - 1)
    def _():
        o_ref[...] = _layer_norm(x, fln_g_ref[...],
                                 fln_b_ref[...]).astype(o_ref.dtype)


# -------------------------------- wrappers -----------------------------------

def sinusoidal_pos_embedding(seq_len, dim):
    """fairseq SinusoidalPositionalEmbedding (padding_idx=0, positions=1..S)."""
    half = dim // 2
    log_timescale = math.log(10000.0) / (half - 1)
    inv_freq = jnp.exp(jnp.arange(half, dtype=jnp.float32) * -log_timescale)
    pos = jnp.arange(1, seq_len + 1, dtype=jnp.float32)
    args = pos[:, None] * inv_freq[None, :]
    pe = jnp.concatenate([jnp.sin(args), jnp.cos(args)], axis=1)
    if dim % 2 == 1:
        pe = jnp.concatenate([pe, jnp.zeros((seq_len, 1), jnp.float32)], axis=1)
    return pe                                                           # (S, E)


def xavier_uniform(key, shape):
    fan_out, fan_in = shape          # PyTorch Linear weight layout (out, in)
    bound = math.sqrt(6.0 / (fan_in + fan_out))
    return jax.random.uniform(key, shape, jnp.float32, -bound, bound)


def init_params(key, embed_dim, num_layers, num_heads):
    """Weights stacked over layers, pre-transposed to (in, out), QKV fused,
    attention scaling folded in, matmul weights stored as bf16."""
    E = embed_dim
    D = E // num_heads
    scaling = D ** -0.5
    layer_keys = jax.random.split(key, num_layers)
    wqkv, wo, w1, w2 = [], [], [], []
    for k in layer_keys:
        k0, k1, k2, k3 = jax.random.split(k, 4)
        in_proj = xavier_uniform(k0, (3 * E, E)).T           # (E, 3E)
        in_proj = in_proj.at[:, :E].multiply(scaling)        # fold q scaling
        wqkv.append(in_proj.astype(jnp.bfloat16))
        wo.append(xavier_uniform(k1, (E, E)).T.astype(jnp.bfloat16))
        w1.append(xavier_uniform(k2, (4 * E, E)).T.astype(jnp.bfloat16))
        w2.append(xavier_uniform(k3, (E, 4 * E)).T.astype(jnp.bfloat16))
    L = num_layers
    zeros = lambda *s: jnp.zeros(s, jnp.float32)
    ones = lambda *s: jnp.ones(s, jnp.float32)
    bqkv = zeros(L, 1, 3 * E)
    bqkv = bqkv.at[:, :, :E].multiply(scaling)   # fold q scaling (zeros anyway)
    return dict(
        ln0_g=ones(L, 1, E), ln0_b=zeros(L, 1, E),
        wqkv=jnp.stack(wqkv), bqkv=bqkv,
        wo=jnp.stack(wo), bo=zeros(L, 1, E),
        ln1_g=ones(L, 1, E), ln1_b=zeros(L, 1, E),
        w1=jnp.stack(w1), b1=zeros(L, 1, 4 * E),
        w2=jnp.stack(w2), b2=zeros(L, 1, E),
        fln_g=ones(1, E), fln_b=zeros(1, E),
    )


def _pick_batch_tile(B, S, target_rows=256):
    """Bt*S should fill MXU rows (>=256 on v6e/v7x); keep >=2 batch grid steps
    when possible so the 'parallel' axis can shard across v7x's two TCs."""
    divisors = [d for d in range(1, B + 1) if B % d == 0]
    for d in divisors:                      # smallest tile reaching the target
        if d * S >= target_rows and B // d >= 2:
            return d
    for d in divisors:
        if d * S >= target_rows:
            return d
    two_step = [d for d in divisors if B // d >= 2]
    return max(two_step) if two_step else B


def _vmem_limit_bytes(Bt, S, E, H):
    """Explicit scoped-VMEM budget from the streamed-layer footprint."""
    N = Bt * S
    w_layer = 12 * E * E * 2                    # bf16 matmul weights per layer
    small_layer = 14 * E * 4                    # biases + LN params per layer
    act = N * E * 4                             # one (N, E) f32 activation
    ffn = N * 4 * E * 4                         # (N, 4E) f32 FFN intermediate
    scores = Bt * H * S * S * 4                 # (H*Bt, S, S) f32 attn scores
    need = (2 * (w_layer + small_layer)         # double-buffered layer slice
            + 8 * act + 2 * ffn + 2 * scores + 2 * S * E * 4)
    return int(min(64 * 2 ** 20, max(16 * 2 ** 20, 2 * need)))


def transformer_encoder(x_in, params, *, num_heads):
    """x_in: (seq, batch, embed) float32 -> (seq, batch, embed) float32."""
    S, B, E = x_in.shape
    assert E % num_heads == 0, "embed_dim must be divisible by num_heads"
    L = params["wqkv"].shape[0]

    Bt = _pick_batch_tile(B, S)
    nb = B // Bt

    x = jnp.transpose(x_in, (1, 0, 2)).astype(jnp.float32)   # (B, S, E)
    pos = sinusoidal_pos_embedding(S, E)                      # (S, E)

    kernel = functools.partial(fused_encoder_kernel,
                               num_heads=num_heads, embed_scale=math.sqrt(E))

    def layer_spec(arr):
        # Stacked (L, ...) weights: one layer slice per grid step, indexed by l
        # (default double-buffering prefetches layer l+1 behind layer l).
        nd = arr.ndim
        return pl.BlockSpec((1,) + arr.shape[1:],
                            lambda b, l, nd=nd: (l,) + (0,) * (nd - 1))

    def const_spec(arr):
        nd = arr.ndim
        return pl.BlockSpec(arr.shape, lambda b, l, nd=nd: (0,) * nd)

    layer_order = ("ln0_g", "ln0_b", "wqkv", "bqkv", "wo", "bo",
                   "ln1_g", "ln1_b", "w1", "b1", "w2", "b2")
    layer_args = [params[k] for k in layer_order]
    const_args = [params["fln_g"], params["fln_b"]]

    in_specs = ([pl.BlockSpec((Bt, S, E), lambda b, l: (b, 0, 0)),  # activations
                 pl.BlockSpec((S, E), lambda b, l: (0, 0))]         # pos-emb
                + [layer_spec(w) for w in layer_args]
                + [const_spec(w) for w in const_args])

    out = pl.pallas_call(
        kernel,
        out_shape=jax.ShapeDtypeStruct((B, S, E), jnp.float32),
        grid=(nb, L),
        in_specs=in_specs,
        out_specs=pl.BlockSpec((Bt, S, E), lambda b, l: (b, 0, 0)),
        scratch_shapes=[pltpu.VMEM((Bt, S, E), jnp.float32)],
        compiler_params=pltpu.CompilerParams(
            dimension_semantics=("parallel", "arbitrary"),
            vmem_limit_bytes=_vmem_limit_bytes(Bt, S, E, num_heads)),
    )(x, pos, *layer_args, *const_args)

    return jnp.transpose(out, (1, 0, 2))                      # back to (S, B, E)


# ---------------------------------- main -------------------------------------

if __name__ == "__main__":
    SEQ, BATCH, EMBED, HEADS, LAYERS = 8, 2, 32, 4, 2

    key = jax.random.PRNGKey(0)
    k_x, k_p = jax.random.split(key)
    x_in = jax.random.normal(k_x, (SEQ, BATCH, EMBED), jnp.float32)
    params = init_params(k_p, EMBED, LAYERS, HEADS)

    out = transformer_encoder(x_in, params, num_heads=HEADS)
    jax.block_until_ready(out)
    assert out.shape == (SEQ, BATCH, EMBED), out.shape
    assert bool(jnp.all(jnp.isfinite(out)))
    print("KERNEL_OK")
</pallas_src>

<mosaic_0001>
module attributes {stable_mosaic.version = 11 : i64} {
  func.func @fused_encoder_kernel(%arg0: i32, %arg1: i32, %arg2: memref<1x8x32xf32, #tpu.memory_space<vmem>>, %arg3: memref<8x32xf32, #tpu.memory_space<vmem>>, %arg4: memref<1x1x32xf32, #tpu.memory_space<vmem>>, %arg5: memref<1x1x32xf32, #tpu.memory_space<vmem>>, %arg6: memref<1x32x96xbf16, #tpu.memory_space<vmem>>, %arg7: memref<1x1x96xf32, #tpu.memory_space<vmem>>, %arg8: memref<1x32x32xbf16, #tpu.memory_space<vmem>>, %arg9: memref<1x1x32xf32, #tpu.memory_space<vmem>>, %arg10: memref<1x1x32xf32, #tpu.memory_space<vmem>>, %arg11: memref<1x1x32xf32, #tpu.memory_space<vmem>>, %arg12: memref<1x32x128xbf16, #tpu.memory_space<vmem>>, %arg13: memref<1x1x128xf32, #tpu.memory_space<vmem>>, %arg14: memref<1x128x32xbf16, #tpu.memory_space<vmem>>, %arg15: memref<1x1x32xf32, #tpu.memory_space<vmem>>, %arg16: memref<1x32xf32, #tpu.memory_space<vmem>>, %arg17: memref<1x32xf32, #tpu.memory_space<vmem>>, %arg18: memref<1x8x32xf32, #tpu.memory_space<vmem>>, %arg19: memref<1x8x32xf32, #tpu.memory_space<vmem>>) attributes {dimension_semantics = [#tpu.dimension_semantics<parallel>, #tpu.dimension_semantics<arbitrary>], iteration_bounds = array<i64: 2, 2>, scalar_prefetch = 0 : i64, scratch_operands = 1 : i64, tpu.core_type = #tpu.core_type<tc>, window_params = [{transform_indices = @transform_0, window_bounds = array<i64: 1, 8, 32>}, {pipeline_mode = #tpu.pipeline_mode<synchronous>, transform_indices = @transform_1, window_bounds = array<i64: 8, 32>}, {transform_indices = @transform_2, window_bounds = array<i64: 1, 1, 32>}, {transform_indices = @transform_3, window_bounds = array<i64: 1, 1, 32>}, {transform_indices = @transform_4, window_bounds = array<i64: 1, 32, 96>}, {transform_indices = @transform_5, window_bounds = array<i64: 1, 1, 96>}, {transform_indices = @transform_6, window_bounds = array<i64: 1, 32, 32>}, {transform_indices = @transform_7, window_bounds = array<i64: 1, 1, 32>}, {transform_indices = @transform_8, window_bounds = array<i64: 1, 1, 32>}, {transform_indices = @transform_9, window_bounds = array<i64: 1, 1, 32>}, {transform_indices = @transform_10, window_bounds = array<i64: 1, 32, 128>}, {transform_indices = @transform_11, window_bounds = array<i64: 1, 1, 128>}, {transform_indices = @transform_12, window_bounds = array<i64: 1, 128, 32>}, {transform_indices = @transform_13, window_bounds = array<i64: 1, 1, 32>}, {pipeline_mode = #tpu.pipeline_mode<synchronous>, transform_indices = @transform_14, window_bounds = array<i64: 1, 32>}, {pipeline_mode = #tpu.pipeline_mode<synchronous>, transform_indices = @transform_15, window_bounds = array<i64: 1, 32>}, {transform_indices = @transform_16, window_bounds = array<i64: 1, 8, 32>}]} {
    %c0_i32 = arith.constant 0 : i32
    %0 = arith.cmpi eq, %arg1, %c0_i32 : i32
    %1 = arith.extui %0 : i1 to i32
    %c0_i32_0 = arith.constant 0 : i32
    %2 = arith.cmpi ne, %1, %c0_i32_0 : i32
    scf.if %2 {
      %c0_61 = arith.constant 0 : index
      %c0_62 = arith.constant 0 : index
      %c0_63 = arith.constant 0 : index
      %167 = vector.load %arg2[%c0_61, %c0_62, %c0_63] : memref<1x8x32xf32, #tpu.memory_space<vmem>>, vector<1x8x32xf32>
      %cst_64 = arith.constant 5.65685415 : f32
      %168 = vector.broadcast %cst_64 : f32 to vector<1x8x32xf32>
      %169 = arith.mulf %167, %168 : vector<1x8x32xf32>
      %c0_65 = arith.constant 0 : index
      %c0_66 = arith.constant 0 : index
      %170 = vector.load %arg3[%c0_65, %c0_66] : memref<8x32xf32, #tpu.memory_space<vmem>>, vector<8x32xf32>
      %171 = vector.shape_cast %170 : vector<8x32xf32> to vector<1x8x32xf32>
      %172 = arith.addf %169, %171 : vector<1x8x32xf32>
      %c0_67 = arith.constant 0 : index
      %c0_68 = arith.constant 0 : index
      %c0_69 = arith.constant 0 : index
      %173 = vector.load %arg19[%c0_67, %c0_68, %c0_69] : memref<1x8x32xf32, #tpu.memory_space<vmem>>, vector<1x8x32xf32>
      tpu.vector_store %arg19[%c0_67, %c0_68, %c0_69], %172 {strides = array<i32>} : memref<1x8x32xf32, #tpu.memory_space<vmem>>, vector<1x8x32xf32>,
    } else {
    }
    %c0 = arith.constant 0 : index
    %c0_1 = arith.constant 0 : index
    %c0_2 = arith.constant 0 : index
    %3 = vector.load %arg19[%c0, %c0_1, %c0_2] : memref<1x8x32xf32, #tpu.memory_space<vmem>>, vector<1x8x32xf32>
    %c0_3 = arith.constant 0 : index
    %c0_4 = arith.constant 0 : index
    %c0_5 = arith.constant 0 : index
    %4 = vector.load %arg4[%c0_3, %c0_4, %c0_5] : memref<1x1x32xf32, #tpu.memory_space<vmem>>, vector<1x1x32xf32>
    %5 = vector.shape_cast %4 : vector<1x1x32xf32> to vector<1x32xf32>
    %c0_6 = arith.constant 0 : index
    %c0_7 = arith.constant 0 : index
    %c0_8 = arith.constant 0 : index
    %6 = vector.load %arg5[%c0_6, %c0_7, %c0_8] : memref<1x1x32xf32, #tpu.memory_space<vmem>>, vector<1x1x32xf32>
    %7 = vector.shape_cast %6 : vector<1x1x32xf32> to vector<1x32xf32>
    %cst = arith.constant dense<0.000000e+00> : vector<1x8xf32>
    %8 = vector.multi_reduction <add>, %3, %cst [2] : vector<1x8x32xf32> to vector<1x8xf32>
    %9 = vector.shape_cast %8 : vector<1x8xf32> to vector<1x8x1xf32>
    %cst_9 = arith.constant 3.200000e+01 : f32
    %10 = vector.broadcast %cst_9 : f32 to vector<1x8x1xf32>
    %11 = arith.divf %9, %10 : vector<1x8x1xf32>
    %12 = vector.broadcast %11 : vector<1x8x1xf32> to vector<1x8x32xf32>
    %13 = arith.subf %3, %12 : vector<1x8x32xf32>
    %14 = arith.mulf %13, %13 : vector<1x8x32xf32>
    %cst_10 = arith.constant dense<0.000000e+00> : vector<1x8xf32>
    %15 = vector.multi_reduction <add>, %14, %cst_10 [2] : vector<1x8x32xf32> to vector<1x8xf32>
    %16 = vector.shape_cast %15 : vector<1x8xf32> to vector<1x8x1xf32>
    %cst_11 = arith.constant 3.200000e+01 : f32
    %17 = vector.broadcast %cst_11 : f32 to vector<1x8x1xf32>
    %18 = arith.divf %16, %17 : vector<1x8x1xf32>
    %19 = vector.broadcast %11 : vector<1x8x1xf32> to vector<1x8x32xf32>
    %20 = arith.subf %3, %19 : vector<1x8x32xf32>
    %cst_12 = arith.constant 9.99999974E-6 : f32
    %21 = vector.broadcast %cst_12 : f32 to vector<1x8x1xf32>
    %22 = arith.addf %18, %21 : vector<1x8x1xf32>
    %23 = math.rsqrt %22 : vector<1x8x1xf32>
    %24 = vector.broadcast %23 : vector<1x8x1xf32> to vector<1x8x32xf32>
    %25 = arith.mulf %20, %24 : vector<1x8x32xf32>
    %26 = vector.shape_cast %5 : vector<1x32xf32> to vector<1x1x32xf32>
    %27 = vector.broadcast %26 : vector<1x1x32xf32> to vector<1x8x32xf32>
    %28 = arith.mulf %25, %27 : vector<1x8x32xf32>
    %29 = vector.shape_cast %7 : vector<1x32xf32> to vector<1x1x32xf32>
    %30 = vector.broadcast %29 : vector<1x1x32xf32> to vector<1x8x32xf32>
    %31 = arith.addf %28, %30 : vector<1x8x32xf32>
    %32 = vector.shape_cast %31 : vector<1x8x32xf32> to vector<8x32xf32>
    %33 = arith.truncf %32 : vector<8x32xf32> to vector<8x32xbf16>
    %c0_13 = arith.constant 0 : index
    %c0_14 = arith.constant 0 : index
    %c0_15 = arith.constant 0 : index
    %34 = vector.load %arg6[%c0_13, %c0_14, %c0_15] : memref<1x32x96xbf16, #tpu.memory_space<vmem>>, vector<1x32x96xbf16>
    %35 = vector.shape_cast %34 : vector<1x32x96xbf16> to vector<32x96xbf16>
    %cst_16 = arith.constant dense<0.000000e+00> : vector<8x96xf32>
    %36 = tpu.matmul %33, %35, %cst_16 {dimension_numbers = #tpu.dot_dimension_numbers<[1], [0], [0], [1], [0, 0, 1, 1], [], []>} : vector<8x32xbf16>, vector<32x96xbf16>, vector<8x96xf32> -> vector<8x96xf32>
    %c0_17 = arith.constant 0 : index
    %c0_18 = arith.constant 0 : index
    %c0_19 = arith.constant 0 : index
    %37 = vector.load %arg7[%c0_17, %c0_18, %c0_19] : memref<1x1x96xf32, #tpu.memory_space<vmem>>, vector<1x1x96xf32>
    %38 = vector.shape_cast %37 : vector<1x1x96xf32> to vector<1x96xf32>
    %39 = vector.broadcast %38 : vector<1x96xf32> to vector<8x96xf32>
    %40 = arith.addf %36, %39 : vector<8x96xf32>
    %41 = vector.extract_strided_slice %40 {offsets = [0, 0], sizes = [8, 32], strides = [1, 1]} : vector<8x96xf32> to vector<8x32xf32>
    %42 = vector.shape_cast %41 : vector<8x32xf32> to vector<1x8x32xf32>
    %43 = vector.extract_strided_slice %40 {offsets = [0, 32], sizes = [8, 32], strides = [1, 1]} : vector<8x96xf32> to vector<8x32xf32>
    %44 = vector.shape_cast %43 : vector<8x32xf32> to vector<1x8x32xf32>
    %45 = vector.extract_strided_slice %40 {offsets = [0, 64], sizes = [8, 32], strides = [1, 1]} : vector<8x96xf32> to vector<8x32xf32>
    %46 = vector.shape_cast %45 : vector<8x32xf32> to vector<1x8x32xf32>
    %47 = vector.extract_strided_slice %42 {offsets = [0, 0, 0], sizes = [1, 8, 8], strides = [1, 1, 1]} : vector<1x8x32xf32> to vector<1x8x8xf32>
    %48 = vector.extract_strided_slice %42 {offsets = [0, 0, 8], sizes = [1, 8, 8], strides = [1, 1, 1]} : vector<1x8x32xf32> to vector<1x8x8xf32>
    %49 = vector.extract_strided_slice %42 {offsets = [0, 0, 16], sizes = [1, 8, 8], strides = [1, 1, 1]} : vector<1x8x32xf32> to vector<1x8x8xf32>
    %50 = vector.extract_strided_slice %42 {offsets = [0, 0, 24], sizes = [1, 8, 8], strides = [1, 1, 1]} : vector<1x8x32xf32> to vector<1x8x8xf32>
    %51 = vector.shape_cast %47 : vector<1x8x8xf32> to vector<1x1x8x8xf32>
    %52 = vector.shape_cast %48 : vector<1x8x8xf32> to vector<1x1x8x8xf32>
    %53 = vector.shape_cast %49 : vector<1x8x8xf32> to vector<1x1x8x8xf32>
    %54 = vector.shape_cast %50 : vector<1x8x8xf32> to vector<1x1x8x8xf32>
    %55 = tpu.concatenate %51, %52, %53, %54 in 0 : vector<1x1x8x8xf32>, vector<1x1x8x8xf32>, vector<1x1x8x8xf32>, vector<1x1x8x8xf32> -> vector<4x1x8x8xf32>
    %56 = vector.shape_cast %55 : vector<4x1x8x8xf32> to vector<4x8x8xf32>
    %57 = arith.truncf %56 : vector<4x8x8xf32> to vector<4x8x8xbf16>
    %58 = vector.extract_strided_slice %44 {offsets = [0, 0, 0], sizes = [1, 8, 8], strides = [1, 1, 1]} : vector<1x8x32xf32> to vector<1x8x8xf32>
    %59 = vector.extract_strided_slice %44 {offsets = [0, 0, 8], sizes = [1, 8, 8], strides = [1, 1, 1]} : vector<1x8x32xf32> to vector<1x8x8xf32>
    %60 = vector.extract_strided_slice %44 {offsets = [0, 0, 16], sizes = [1, 8, 8], strides = [1, 1, 1]} : vector<1x8x32xf32> to vector<1x8x8xf32>
    %61 = vector.extract_strided_slice %44 {offsets = [0, 0, 24], sizes = [1, 8, 8], strides = [1, 1, 1]} : vector<1x8x32xf32> to vector<1x8x8xf32>
    %62 = vector.shape_cast %58 : vector<1x8x8xf32> to vector<1x1x8x8xf32>
    %63 = vector.shape_cast %59 : vector<1x8x8xf32> to vector<1x1x8x8xf32>
    %64 = vector.shape_cast %60 : vector<1x8x8xf32> to vector<1x1x8x8xf32>
    %65 = vector.shape_cast %61 : vector<1x8x8xf32> to vector<1x1x8x8xf32>
    %66 = tpu.concatenate %62, %63, %64, %65 in 0 : vector<1x1x8x8xf32>, vector<1x1x8x8xf32>, vector<1x1x8x8xf32>, vector<1x1x8x8xf32> -> vector<4x1x8x8xf32>
    %67 = vector.shape_cast %66 : vector<4x1x8x8xf32> to vector<4x8x8xf32>
    %68 = arith.truncf %67 : vector<4x8x8xf32> to vector<4x8x8xbf16>
    %69 = vector.extract_strided_slice %46 {offsets = [0, 0, 0], sizes = [1, 8, 8], strides = [1, 1, 1]} : vector<1x8x32xf32> to vector<1x8x8xf32>
    %70 = vector.extract_strided_slice %46 {offsets = [0, 0, 8], sizes = [1, 8, 8], strides = [1, 1, 1]} : vector<1x8x32xf32> to vector<1x8x8xf32>
    %71 = vector.extract_strided_slice %46 {offsets = [0, 0, 16], sizes = [1, 8, 8], strides = [1, 1, 1]} : vector<1x8x32xf32> to vector<1x8x8xf32>
    %72 = vector.extract_strided_slice %46 {offsets = [0, 0, 24], sizes = [1, 8, 8], strides = [1, 1, 1]} : vector<1x8x32xf32> to vector<1x8x8xf32>
    %73 = vector.shape_cast %69 : vector<1x8x8xf32> to vector<1x1x8x8xf32>
    %74 = vector.shape_cast %70 : vector<1x8x8xf32> to vector<1x1x8x8xf32>
    %75 = vector.shape_cast %71 : vector<1x8x8xf32> to vector<1x1x8x8xf32>
    %76 = vector.shape_cast %72 : vector<1x8x8xf32> to vector<1x1x8x8xf32>
    %77 = tpu.concatenate %73, %74, %75, %76 in 0 : vector<1x1x8x8xf32>, vector<1x1x8x8xf32>, vector<1x1x8x8xf32>, vector<1x1x8x8xf32> -> vector<4x1x8x8xf32>
    %78 = vector.shape_cast %77 : vector<4x1x8x8xf32> to vector<4x8x8xf32>
    %79 = arith.truncf %78 : vector<4x8x8xf32> to vector<4x8x8xbf16>
    "tpu.trace_start"() <{level = 10 : i32, message = "bqd,bkd->bqk"}> : () -> ()
    %cst_20 = arith.constant dense<0.000000e+00> : vector<4x8x8xf32>
    %80 = tpu.matmul %57, %68, %cst_20 {dimension_numbers = #tpu.dot_dimension_numbers<[2], [2], [1], [1], [0, 0, 0, 1, 1, 1], [0], [0]>} : vector<4x8x8xbf16>, vector<4x8x8xbf16>, vector<4x8x8xf32> -> vector<4x8x8xf32>
    "tpu.trace_stop"() : () -> ()
    %cst_21 = arith.constant dense<0xFF800000> : vector<4x8xf32>
    %81 = vector.multi_reduction <maximumf>, %80, %cst_21 [2] : vector<4x8x8xf32> to vector<4x8xf32>
    %82 = vector.shape_cast %81 : vector<4x8xf32> to vector<4x8x1xf32>
    %83 = vector.broadcast %82 : vector<4x8x1xf32> to vector<4x8x8xf32>
    %84 = arith.subf %80, %83 : vector<4x8x8xf32>
    %85 = math.exp %84 : vector<4x8x8xf32>
    %cst_22 = arith.constant dense<0.000000e+00> : vector<4x8xf32>
    %86 = vector.multi_reduction <add>, %85, %cst_22 [2] : vector<4x8x8xf32> to vector<4x8xf32>
    %87 = vector.shape_cast %86 : vector<4x8xf32> to vector<4x8x1xf32>
    %88 = tpu.reciprocal %87 {approx = true} : vector<4x8x1xf32> -> vector<4x8x1xf32>
    %89 = vector.broadcast %88 : vector<4x8x1xf32> to vector<4x8x8xf32>
    %90 = arith.mulf %85, %89 : vector<4x8x8xf32>
    %91 = arith.truncf %90 : vector<4x8x8xf32> to vector<4x8x8xbf16>
    "tpu.trace_start"() <{level = 10 : i32, message = "bqk,bkd->bqd"}> : () -> ()
    %cst_23 = arith.constant dense<0.000000e+00> : vector<4x8x8xf32>
    %92 = tpu.matmul %91, %79, %cst_23 {dimension_numbers = #tpu.dot_dimension_numbers<[2], [1], [1], [2], [0, 0, 0, 1, 1, 2], [0], [0]>} : vector<4x8x8xbf16>, vector<4x8x8xbf16>, vector<4x8x8xf32> -> vector<4x8x8xf32>
    "tpu.trace_stop"() : () -> ()
    %93 = vector.shape_cast %92 : vector<4x8x8xf32> to vector<4x1x8x8xf32>
    %94 = vector.extract_strided_slice %93 {offsets = [0, 0, 0, 0], sizes = [1, 1, 8, 8], strides = [1, 1, 1, 1]} : vector<4x1x8x8xf32> to vector<1x1x8x8xf32>
    %95 = vector.shape_cast %94 : vector<1x1x8x8xf32> to vector<1x8x8xf32>
    %96 = vector.extract_strided_slice %93 {offsets = [1, 0, 0, 0], sizes = [1, 1, 8, 8], strides = [1, 1, 1, 1]} : vector<4x1x8x8xf32> to vector<1x1x8x8xf32>
    %97 = vector.shape_cast %96 : vector<1x1x8x8xf32> to vector<1x8x8xf32>
    %98 = vector.extract_strided_slice %93 {offsets = [2, 0, 0, 0], sizes = [1, 1, 8, 8], strides = [1, 1, 1, 1]} : vector<4x1x8x8xf32> to vector<1x1x8x8xf32>
    %99 = vector.shape_cast %98 : vector<1x1x8x8xf32> to vector<1x8x8xf32>
    %100 = vector.extract_strided_slice %93 {offsets = [3, 0, 0, 0], sizes = [1, 1, 8, 8], strides = [1, 1, 1, 1]} : vector<4x1x8x8xf32> to vector<1x1x8x8xf32>
    %101 = vector.shape_cast %100 : vector<1x1x8x8xf32> to vector<1x8x8xf32>
    %102 = tpu.concatenate %95, %97, %99, %101 in 2 : vector<1x8x8xf32>, vector<1x8x8xf32>, vector<1x8x8xf32>, vector<1x8x8xf32> -> vector<1x8x32xf32>
    %103 = vector.shape_cast %102 : vector<1x8x32xf32> to vector<8x32xf32>
    %104 = arith.truncf %103 : vector<8x32xf32> to vector<8x32xbf16>
    %c0_24 = arith.constant 0 : index
    %c0_25 = arith.constant 0 : index
    %c0_26 = arith.constant 0 : index
    %105 = vector.load %arg8[%c0_24, %c0_25, %c0_26] : memref<1x32x32xbf16, #tpu.memory_space<vmem>>, vector<1x32x32xbf16>
    %106 = vector.shape_cast %105 : vector<1x32x32xbf16> to vector<32x32xbf16>
    %cst_27 = arith.constant dense<0.000000e+00> : vector<8x32xf32>
    %107 = tpu.matmul %104, %106, %cst_27 {dimension_numbers = #tpu.dot_dimension_numbers<[1], [0], [0], [1], [0, 0, 1, 1], [], []>} : vector<8x32xbf16>, vector<32x32xbf16>, vector<8x32xf32> -> vector<8x32xf32>
    %c0_28 = arith.constant 0 : index
    %c0_29 = arith.constant 0 : index
    %c0_30 = arith.constant 0 : index
    %108 = vector.load %arg9[%c0_28, %c0_29, %c0_30] : memref<1x1x32xf32, #tpu.memory_space<vmem>>, vector<1x1x32xf32>
    %109 = vector.shape_cast %108 : vector<1x1x32xf32> to vector<1x32xf32>
    %110 = vector.broadcast %109 : vector<1x32xf32> to vector<8x32xf32>
    %111 = arith.addf %107, %110 : vector<8x32xf32>
    %112 = vector.shape_cast %111 : vector<8x32xf32> to vector<1x8x32xf32>
    %113 = arith.addf %3, %112 : vector<1x8x32xf32>
    %c0_31 = arith.constant 0 : index
    %c0_32 = arith.constant 0 : index
    %c0_33 = arith.constant 0 : index
    %114 = vector.load %arg10[%c0_31, %c0_32, %c0_33] : memref<1x1x32xf32, #tpu.memory_space<vmem>>, vector<1x1x32xf32>
    %115 = vector.shape_cast %114 : vector<1x1x32xf32> to vector<1x32xf32>
    %c0_34 = arith.constant 0 : index
    %c0_35 = arith.constant 0 : index
    %c0_36 = arith.constant 0 : index
    %116 = vector.load %arg11[%c0_34, %c0_35, %c0_36] : memref<1x1x32xf32, #tpu.memory_space<vmem>>, vector<1x1x32xf32>
    %117 = vector.shape_cast %116 : vector<1x1x32xf32> to vector<1x32xf32>
    %cst_37 = arith.constant dense<0.000000e+00> : vector<1x8xf32>
    %118 = vector.multi_reduction <add>, %113, %cst_37 [2] : vector<1x8x32xf32> to vector<1x8xf32>
    %119 = vector.shape_cast %118 : vector<1x8xf32> to vector<1x8x1xf32>
    %cst_38 = arith.constant 3.200000e+01 : f32
    %120 = vector.broadcast %cst_38 : f32 to vector<1x8x1xf32>
    %121 = arith.divf %119, %120 : vector<1x8x1xf32>
    %122 = vector.broadcast %121 : vector<1x8x1xf32> to vector<1x8x32xf32>
    %123 = arith.subf %113, %122 : vector<1x8x32xf32>
    %124 = arith.mulf %123, %123 : vector<1x8x32xf32>
    %cst_39 = arith.constant dense<0.000000e+00> : vector<1x8xf32>
    %125 = vector.multi_reduction <add>, %124, %cst_39 [2] : vector<1x8x32xf32> to vector<1x8xf32>
    %126 = vector.shape_cast %125 : vector<1x8xf32> to vector<1x8x1xf32>
    %cst_40 = arith.constant 3.200000e+01 : f32
    %127 = vector.broadcast %cst_40 : f32 to vector<1x8x1xf32>
    %128 = arith.divf %126, %127 : vector<1x8x1xf32>
    %129 = vector.broadcast %121 : vector<1x8x1xf32> to vector<1x8x32xf32>
    %130 = arith.subf %113, %129 : vector<1x8x32xf32>
    %cst_41 = arith.constant 9.99999974E-6 : f32
    %131 = vector.broadcast %cst_41 : f32 to vector<1x8x1xf32>
    %132 = arith.addf %128, %131 : vector<1x8x1xf32>
    %133 = math.rsqrt %132 : vector<1x8x1xf32>
    %134 = vector.broadcast %133 : vector<1x8x1xf32> to vector<1x8x32xf32>
    %135 = arith.mulf %130, %134 : vector<1x8x32xf32>
    %136 = vector.shape_cast %115 : vector<1x32xf32> to vector<1x1x32xf32>
    %137 = vector.broadcast %136 : vector<1x1x32xf32> to vector<1x8x32xf32>
    %138 = arith.mulf %135, %137 : vector<1x8x32xf32>
    %139 = vector.shape_cast %117 : vector<1x32xf32> to vector<1x1x32xf32>
    %140 = vector.broadcast %139 : vector<1x1x32xf32> to vector<1x8x32xf32>
    %141 = arith.addf %138, %140 : vector<1x8x32xf32>
    %142 = vector.shape_cast %141 : vector<1x8x32xf32> to vector<8x32xf32>
    %143 = arith.truncf %142 : vector<8x32xf32> to vector<8x32xbf16>
    %c0_42 = arith.constant 0 : index
    %c0_43 = arith.constant 0 : index
    %c0_44 = arith.constant 0 : index
    %144 = vector.load %arg12[%c0_42, %c0_43, %c0_44] : memref<1x32x128xbf16, #tpu.memory_space<vmem>>, vector<1x32x128xbf16>
    %145 = vector.shape_cast %144 : vector<1x32x128xbf16> to vector<32x128xbf16>
    %cst_45 = arith.constant dense<0.000000e+00> : vector<8x128xf32>
    %146 = tpu.matmul %143, %145, %cst_45 {dimension_numbers = #tpu.dot_dimension_numbers<[1], [0], [0], [1], [0, 0, 1, 1], [], []>} : vector<8x32xbf16>, vector<32x128xbf16>, vector<8x128xf32> -> vector<8x128xf32>
    %c0_46 = arith.constant 0 : index
    %c0_47 = arith.constant 0 : index
    %c0_48 = arith.constant 0 : index
    %147 = vector.load %arg13[%c0_46, %c0_47, %c0_48] : memref<1x1x128xf32, #tpu.memory_space<vmem>>, vector<1x1x128xf32>
    %148 = vector.shape_cast %147 : vector<1x1x128xf32> to vector<1x128xf32>
    %149 = vector.broadcast %148 : vector<1x128xf32> to vector<8x128xf32>
    %150 = arith.addf %146, %149 : vector<8x128xf32>
    %cst_49 = arith.constant 0.000000e+00 : f32
    %151 = vector.broadcast %cst_49 : f32 to vector<8x128xf32>
    %152 = arith.maximumf %150, %151 : vector<8x128xf32>
    %153 = arith.truncf %152 : vector<8x128xf32> to vector<8x128xbf16>
    %c0_50 = arith.constant 0 : index
    %c0_51 = arith.constant 0 : index
    %c0_52 = arith.constant 0 : index
    %154 = vector.load %arg14[%c0_50, %c0_51, %c0_52] : memref<1x128x32xbf16, #tpu.memory_space<vmem>>, vector<1x128x32xbf16>
    %155 = vector.shape_cast %154 : vector<1x128x32xbf16> to vector<128x32xbf16>
    %cst_53 = arith.constant dense<0.000000e+00> : vector<8x32xf32>
    %156 = tpu.matmul %153, %155, %cst_53 {dimension_numbers = #tpu.dot_dimension_numbers<[1], [0], [0], [1], [0, 0, 1, 1], [], []>} : vector<8x128xbf16>, vector<128x32xbf16>, vector<8x32xf32> -> vector<8x32xf32>
    %c0_54 = arith.constant 0 : index
    %c0_55 = arith.constant 0 : index
    %c0_56 = arith.constant 0 : index
    %157 = vector.load %arg15[%c0_54, %c0_55, %c0_56] : memref<1x1x32xf32, #tpu.memory_space<vmem>>, vector<1x1x32xf32>
    %158 = vector.shape_cast %157 : vector<1x1x32xf32> to vector<1x32xf32>
    %159 = vector.broadcast %158 : vector<1x32xf32> to vector<8x32xf32>
    %160 = arith.addf %156, %159 : vector<8x32xf32>
    %161 = vector.shape_cast %160 : vector<8x32xf32> to vector<1x8x32xf32>
    %162 = arith.addf %113, %161 : vector<1x8x32xf32>
    %c0_57 = arith.constant 0 : index
    %c0_58 = arith.constant 0 : index
    %c0_59 = arith.constant 0 : index
    %163 = vector.load %arg19[%c0_57, %c0_58, %c0_59] : memref<1x8x32xf32, #tpu.memory_space<vmem>>, vector<1x8x32xf32>
    tpu.vector_store %arg19[%c0_57, %c0_58, %c0_59], %162 {strides = array<i32>} : memref<1x8x32xf32, #tpu.memory_space<vmem>>, vector<1x8x32xf32>,
    %c1_i32 = arith.constant 1 : i32
    %164 = arith.cmpi eq, %arg1, %c1_i32 : i32
    %165 = arith.extui %164 : i1 to i32
    %c0_i32_60 = arith.constant 0 : i32
    %166 = arith.cmpi ne, %165, %c0_i32_60 : i32
    scf.if %166 {
      %c0_61 = arith.constant 0 : index
      %c0_62 = arith.constant 0 : index
      %167 = vector.load %arg16[%c0_61, %c0_62] : memref<1x32xf32, #tpu.memory_space<vmem>>, vector<1x32xf32>
      %c0_63 = arith.constant 0 : index
      %c0_64 = arith.constant 0 : index
      %168 = vector.load %arg17[%c0_63, %c0_64] : memref<1x32xf32, #tpu.memory_space<vmem>>, vector<1x32xf32>
      %cst_65 = arith.constant dense<0.000000e+00> : vector<1x8xf32>
      %169 = vector.multi_reduction <add>, %162, %cst_65 [2] : vector<1x8x32xf32> to vector<1x8xf32>
      %170 = vector.shape_cast %169 : vector<1x8xf32> to vector<1x8x1xf32>
      %cst_66 = arith.constant 3.200000e+01 : f32
      %171 = vector.broadcast %cst_66 : f32 to vector<1x8x1xf32>
      %172 = arith.divf %170, %171 : vector<1x8x1xf32>
      %173 = vector.broadcast %172 : vector<1x8x1xf32> to vector<1x8x32xf32>
      %174 = arith.subf %162, %173 : vector<1x8x32xf32>
      %175 = arith.mulf %174, %174 : vector<1x8x32xf32>
      %cst_67 = arith.constant dense<0.000000e+00> : vector<1x8xf32>
      %176 = vector.multi_reduction <add>, %175, %cst_67 [2] : vector<1x8x32xf32> to vector<1x8xf32>
      %177 = vector.shape_cast %176 : vector<1x8xf32> to vector<1x8x1xf32>
      %cst_68 = arith.constant 3.200000e+01 : f32
      %178 = vector.broadcast %cst_68 : f32 to vector<1x8x1xf32>
      %179 = arith.divf %177, %178 : vector<1x8x1xf32>
      %180 = vector.broadcast %172 : vector<1x8x1xf32> to vector<1x8x32xf32>
      %181 = arith.subf %162, %180 : vector<1x8x32xf32>
      %cst_69 = arith.constant 9.99999974E-6 : f32
      %182 = vector.broadcast %cst_69 : f32 to vector<1x8x1xf32>
      %183 = arith.addf %179, %182 : vector<1x8x1xf32>
      %184 = math.rsqrt %183 : vector<1x8x1xf32>
      %185 = vector.broadcast %184 : vector<1x8x1xf32> to vector<1x8x32xf32>
      %186 = arith.mulf %181, %185 : vector<1x8x32xf32>
      %187 = vector.shape_cast %167 : vector<1x32xf32> to vector<1x1x32xf32>
      %188 = vector.broadcast %187 : vector<1x1x32xf32> to vector<1x8x32xf32>
      %189 = arith.mulf %186, %188 : vector<1x8x32xf32>
      %190 = vector.shape_cast %168 : vector<1x32xf32> to vector<1x1x32xf32>
      %191 = vector.broadcast %190 : vector<1x1x32xf32> to vector<1x8x32xf32>
      %192 = arith.addf %189, %191 : vector<1x8x32xf32>
      %c0_70 = arith.constant 0 : index
      %c0_71 = arith.constant 0 : index
      %c0_72 = arith.constant 0 : index
      %193 = vector.load %arg18[%c0_70, %c0_71, %c0_72] : memref<1x8x32xf32, #tpu.memory_space<vmem>>, vector<1x8x32xf32>
      tpu.vector_store %arg18[%c0_70, %c0_71, %c0_72], %192 {strides = array<i32>} : memref<1x8x32xf32, #tpu.memory_space<vmem>>, vector<1x8x32xf32>,
    } else {
    }
    return
  }
  func.func @transform_0(%arg0: i32, %arg1: i32) -> (i32, i32, i32) {
    %c0_i32 = arith.constant 0 : i32
    %c0_i32_0 = arith.constant 0 : i32
    %c0_i32_1 = arith.constant 0 : i32
    return %arg0, %c0_i32, %c0_i32_0 : i32, i32, i32
  }
  func.func @transform_1(%arg0: i32, %arg1: i32) -> (i32, i32) {
    %c0_i32 = arith.constant 0 : i32
    %c0_i32_0 = arith.constant 0 : i32
    %c0_i32_1 = arith.constant 0 : i32
    return %c0_i32, %c0_i32_0 : i32, i32
  }
  func.func @transform_2(%arg0: i32, %arg1: i32) -> (i32, i32, i32) {
    %c0_i32 = arith.constant 0 : i32
    %c0_i32_0 = arith.constant 0 : i32
    %c0_i32_1 = arith.constant 0 : i32
    return %arg1, %c0_i32, %c0_i32_0 : i32, i32, i32
  }
  func.func @transform_3(%arg0: i32, %arg1: i32) -> (i32, i32, i32) {
    %c0_i32 = arith.constant 0 : i32
    %c0_i32_0 = arith.constant 0 : i32
    %c0_i32_1 = arith.constant 0 : i32
    return %arg1, %c0_i32, %c0_i32_0 : i32, i32, i32
  }
  func.func @transform_4(%arg0: i32, %arg1: i32) -> (i32, i32, i32) {
    %c0_i32 = arith.constant 0 : i32
    %c0_i32_0 = arith.constant 0 : i32
    %c0_i32_1 = arith.constant 0 : i32
    return %arg1, %c0_i32, %c0_i32_0 : i32, i32, i32
  }
  func.func @transform_5(%arg0: i32, %arg1: i32) -> (i32, i32, i32) {
    %c0_i32 = arith.constant 0 : i32
    %c0_i32_0 = arith.constant 0 : i32
    %c0_i32_1 = arith.constant 0 : i32
    return %arg1, %c0_i32, %c0_i32_0 : i32, i32, i32
  }
  func.func @transform_6(%arg0: i32, %arg1: i32) -> (i32, i32, i32) {
    %c0_i32 = arith.constant 0 : i32
    %c0_i32_0 = arith.constant 0 : i32
    %c0_i32_1 = arith.constant 0 : i32
    return %arg1, %c0_i32, %c0_i32_0 : i32, i32, i32
  }
  func.func @transform_7(%arg0: i32, %arg1: i32) -> (i32, i32, i32) {
    %c0_i32 = arith.constant 0 : i32
    %c0_i32_0 = arith.constant 0 : i32
    %c0_i32_1 = arith.constant 0 : i32
    return %arg1, %c0_i32, %c0_i32_0 : i32, i32, i32
  }
  func.func @transform_8(%arg0: i32, %arg1: i32) -> (i32, i32, i32) {
    %c0_i32 = arith.constant 0 : i32
    %c0_i32_0 = arith.constant 0 : i32
    %c0_i32_1 = arith.constant 0 : i32
    return %arg1, %c0_i32, %c0_i32_0 : i32, i32, i32
  }
  func.func @transform_9(%arg0: i32, %arg1: i32) -> (i32, i32, i32) {
    %c0_i32 = arith.constant 0 : i32
    %c0_i32_0 = arith.constant 0 : i32
    %c0_i32_1 = arith.constant 0 : i32
    return %arg1, %c0_i32, %c0_i32_0 : i32, i32, i32
  }
  func.func @transform_10(%arg0: i32, %arg1: i32) -> (i32, i32, i32) {
    %c0_i32 = arith.constant 0 : i32
    %c0_i32_0 = arith.constant 0 : i32
    %c0_i32_1 = arith.constant 0 : i32
    return %arg1, %c0_i32, %c0_i32_0 : i32, i32, i32
  }
  func.func @transform_11(%arg0: i32, %arg1: i32) -> (i32, i32, i32) {
    %c0_i32 = arith.constant 0 : i32
    %c0_i32_0 = arith.constant 0 : i32
    %c0_i32_1 = arith.constant 0 : i32
    return %arg1, %c0_i32, %c0_i32_0 : i32, i32, i32
  }
  func.func @transform_12(%arg0: i32, %arg1: i32) -> (i32, i32, i32) {
    %c0_i32 = arith.constant 0 : i32
    %c0_i32_0 = arith.constant 0 : i32
    %c0_i32_1 = arith.constant 0 : i32
    return %arg1, %c0_i32, %c0_i32_0 : i32, i32, i32
  }
  func.func @transform_13(%arg0: i32, %arg1: i32) -> (i32, i32, i32) {
    %c0_i32 = arith.constant 0 : i32
    %c0_i32_0 = arith.constant 0 : i32
    %c0_i32_1 = arith.constant 0 : i32
    return %arg1, %c0_i32, %c0_i32_0 : i32, i32, i32
  }
  func.func @transform_14(%arg0: i32, %arg1: i32) -> (i32, i32) {
    %c0_i32 = arith.constant 0 : i32
    %c0_i32_0 = arith.constant 0 : i32
    %c0_i32_1 = arith.constant 0 : i32
    return %c0_i32, %c0_i32_0 : i32, i32
  }
  func.func @transform_15(%arg0: i32, %arg1: i32) -> (i32, i32) {
    %c0_i32 = arith.constant 0 : i32
    %c0_i32_0 = arith.constant 0 : i32
    %c0_i32_1 = arith.constant 0 : i32
    return %c0_i32, %c0_i32_0 : i32, i32
  }
  func.func @transform_16(%arg0: i32, %arg1: i32) -> (i32, i32, i32) {
    %c0_i32 = arith.constant 0 : i32
    %c0_i32_0 = arith.constant 0 : i32
    %c0_i32_1 = arith.constant 0 : i32
    return %arg0, %c0_i32, %c0_i32_0 : i32, i32, i32
  }
}

</mosaic_0001>

<bundles_post_ra>
// kernel: tpu_custom_call.1
= control target key start
LH: loop header
LB: loop body
LE: loop exit
PB: predicated region body
PF: predicated region fallthrough
CT: control target
= control target key end

     0   :  { %s2232_s0 = inlined_call_operand.vmem [shape: f32[2,8,32], index: 0, kind: input, shape index: {}]   ;;  %s2233_s1 = inlined_call_operand.vmem [shape: f32[8,32], index: 1, kind: input, shape index: {}]   ;;  %s2234_s2 = inlined_call_operand.vmem [shape: f32[2,1,32], index: 2, kind: input, shape index: {}]   ;;  %s2235_s3 = inlined_call_operand.vmem [shape: f32[2,1,32], index: 3, kind: input, shape index: {}]   ;;  %s2236_s4 = inlined_call_operand.vmem [shape: bf16[2,32,96], index: 4, kind: input, shape index: {}]   ;;  %s2237_s5 = inlined_call_operand.vmem [shape: f32[2,1,96], index: 5, kind: input, shape index: {}]   ;;  %s2238_s6 = inlined_call_operand.vmem [shape: bf16[2,32,32], index: 6, kind: input, shape index: {}]   ;;  %s2239_s7 = inlined_call_operand.vmem [shape: f32[2,1,32], index: 7, kind: input, shape index: {}]   ;;  %s2240_s8 = inlined_call_operand.vmem [shape: f32[2,1,32], index: 8, kind: input, shape index: {}]   ;;  %s2241_s9 = inlined_call_operand.vmem [shape: f32[2,1,32], index: 9, kind: input, shape index: {}]   ;;  %s2242_s10 = inlined_call_operand.vmem [shape: bf16[2,32,128], index: 10, kind: input, shape index: {}]   ;;  %s2243_s11 = inlined_call_operand.vmem [shape: f32[2,1,128], index: 11, kind: input, shape index: {}]   ;;  %s2244_s12 = inlined_call_operand.vmem [shape: bf16[2,128,32], index: 12, kind: input, shape index: {}]   ;;  %s2245_s13 = inlined_call_operand.vmem [shape: f32[2,1,32], index: 13, kind: input, shape index: {}]   ;;  %s2246_s14 = inlined_call_operand.vmem [shape: f32[1,32], index: 14, kind: input, shape index: {}]   ;;  %s2247_s15 = inlined_call_operand.vmem [shape: f32[1,32], index: 15, kind: input, shape index: {}]   ;;  %s2248_s16 = inlined_call_operand.hbm [shape: f32[2,8,32], index: 16, kind: output, shape index: {}]  }
   0x1   :  { %2264 = sst [smem:[#allocation19_spill]] %s2232_s0 }
   0x2   :  { %2265 = sst [smem:[#allocation20_spill]] %s2233_s1 }
   0x3   :  { %2266 = sst [smem:[#allocation21_spill]] %s2235_s3 }
   0x4   :  { %2267 = sst [smem:[#allocation22_spill]] %s2236_s4 }
   0x5   :  { %2268 = sst [smem:[#allocation23_spill]] %s2238_s6 }
   0x6   :  { %2269 = sst [smem:[#allocation24_spill]] %s2246_s14 }
   0x7   :  { %2270 = sst [smem:[#allocation25_spill]] %s2247_s15 }
   0x8   :  { %2271 = sst [smem:[#allocation26_spill]] %s2248_s16 }
   0x9   :  { %21 = vsyncpa [#allocation4], 0 }
   0xa   :  { %23 = vsyncpa [#allocation4 + $0x1], 0  ;;  %s1916_s21 = smov 0   ;;  %s1918_s22 = smov 0  }
   0xb   :  { %s1920_s23 = smov 0   ;;  %s1922_s24 = smov 0  }
   0xc   :  { %s1924_s25 = smov 0   ;;  %s1926_s26 = smov 0  }
   0xd   :  { %s1928_s27 = smov 0   ;;  %s1930_s28 = smov 0  }
   0xe LB: > { %2272 = sst [smem:[#allocation6_spill]] %s1792_s21  ;;  %s1506_s29 = sadd.s32 4294967295, %s1820_s28   ;;  %s1820_s28 = sphi %s1930_s28, %s29_s28   ;;  %s1816_s27 = sphi %s1928_s27, %s2316_s27   ;;  %s1812_s26 = sphi %s1926_s26, %s2315_s26   ;;  %s1808_s25 = sphi %s1924_s25, %s2314_s25   ;;  %s1804_s24 = sphi %s1922_s24, %s2313_s24   ;;  %s1800_s23 = sphi %s1920_s23, %s2312_s23   ;;  %s1796_s22 = sphi %s1918_s22, %s2311_s22   ;;  %s1792_s21 = sphi %s1916_s21, %s2310_s21  }
   0xf   : > { %2273 = sst [smem:[#allocation7_spill]] %s1796_s22  ;;  %s1507_s30 = sadd.s32 4294967294, %s1820_s28  }
  0x10   : > { %2274 = sst [smem:[#allocation8_spill]] %s1800_s23  ;;  %s38_s0 = sadd.s32 1, %s1812_s26 }
  0x11   : > { %2275 = sst [smem:[#allocation9_spill]] %s1804_s24  ;;  %p39_p0 = scmp.ge.s32.totalorder %s38_s0, 2 }
  0x12   : > { %2276 = sst [smem:[#allocation10_spill]] %s1808_s25  ;;  %s41_s17 = sadd.s32 1, %s1816_s27 }
  0x13   : > { %2277 = sst [smem:[#allocation11_spill]] %s1812_s26  ;;  %p459_p1 = scmp.ne.s32.totalorder %s1800_s23, %s1796_s22 }
  0x14   : > { %2278 = sst [smem:[#allocation12_spill]] %s1816_s27  ;;  %p460_p2 = scmp.eq.s32.totalorder %s1506_s29, 3 }
  0x15   : > { %2279 = sst [smem:[#allocation13_spill]] %s1820_s28  ;;  %s2318_s0 = smov (%p39_p0, %s38_s0), 0 }
  0x16   : > { %2280 = sst [smem:[#allocation14_spill]] %s2318_s0  ;;  %s2320_s17 = smov (!%p39_p0, %s41_s17), %s1816_s27 }
  0x17   : > { %p1965_p3 = por %p460_p2, %p459_p1  ;;  %p465_p4 = scmp.ne.s32.totalorder %s1796_s22, %s1792_s21 }
  0x18   : > { %p43_p5 = scmp.ge.s32.totalorder %s2320_s17, 2  ;;  %p466_p6 = scmp.eq.s32.totalorder %s1507_s30, 3 }
  0x19   : > { %s2281_s18 = scalar_select %p1965_p3, 1, 0 }
  0x1a   : > { %p1510_p7 = scmp.ge.s32.totalorder %s1820_s28, 1  ;;  %p580_p8 = scmp.lt.s32.totalorder %s1820_s28, 5 }
  0x1b   : > { %2282 = sst [smem:[#allocation15_spill]] %s2281_s18  ;;  %s2322_s17 = smov (%p43_p5, %s2320_s17), 0 }
  0x1c   : > { %2283 = sst [smem:[#allocation16_spill]] %s2322_s17  ;;  %p1975_p9 = por %p466_p6, %p465_p4 }
  0x1d   : > { %p581_p10 = pnand %p1510_p7, %p580_p8  ;;  %s446_s20 = ssub.s32 %s1816_s27, %s2322_s17 }
  0x1e   : > { %s2284_s19 = scalar_select %p1975_p9, 1, 0 }
  0x1f   : > { %s449_s29 = sadd.s32 1, %s1800_s23  ;;  %p447_p11 = scmp.eq.s32.totalorder %s446_s20, 0 }
  0x20   : > { %2285 = sst [smem:[#allocation17_spill]] %s2284_s19  ;;  %584 = sbr.rel (%p581_p10) target bundleno = 2307 (0x903), region = 84 }
  0x21   : > { %s1983_s0 = scalar_select %p447_p11, %s1800_s23, %s449_s29  }
  0x22   : > { %s2254_s30 = sand.u32 (!%p581_p10), 1, %s1796_s22   ;;  %p673_p12 = scmp.lt.s32.totalorder (!%p581_p10), %s1808_s25, 1 }
  0x23   : > { %2286 = sst [smem:[#allocation18_spill]] %s1983_s0  ;;  %s1989_s26 = sshll.u32 (!%p581_p10), %s2254_s30, 3 }
  0x24   : > { %p677_p13 = scmp.lt.s32.totalorder (!%p581_p10), %s1804_s24, 1  ;;  %s2287_s27 = sld [smem:[#allocation19_spill]] (!%p581_p10) }
  0x25   : > { %s674_s19 = scalar_select %p673_p12, %s1808_s25, 1 }
  0x26   : > { %s1994_s21 = scalar_select %p677_p13, %s1804_s24, 1 }
  0x27   : > { %s1512_s20 = sshll.u32 %s674_s19, 3  ;;  %s2289_s4 = sld [smem:[#allocation22_spill]] }
  0x28   : > { %s1594_s25 = sshll.u32 %s1994_s21, 4  ;;  %s2290_s6 = sld [smem:[#allocation23_spill]] }
  0x29   : > { %s2037_s19 = scalar_lea.vmem %s2242_s10, %s1594_s25  ;;  %s712_s17 = scalar_lea.vmem %s2243_s11, %s1994_s21 }
  0x2a   : > { %s676_s30 = scalar_lea.vmem %s2287_s27, %s1512_s20  ;;  %s720_s16 = scalar_lea.vmem %s2245_s13, %s1994_s21 }
  0x2b   : > { %s672_s14 = scalar_lea.vmem [#allocation3], %s1989_s26  ;;  %s2291_s15 = sld [smem:[#allocation9_spill]] }
  0x2d   : > { %s2011_s1 = scalar_lea.vmem %s2289_s4, %s1594_s25  ;;  %s704_s4 = scalar_lea.vmem %s2241_s9, %s1994_s21 }
  0x2e   : > { %s2020_s20 = scalar_lea.vmem %s2290_s6, %s1594_s25  ;;  %s1597_s6 = sshll.u32 %s1994_s21, 6 }
  0x2f   : > { %s2051_s28 = scalar_lea.vmem %s2244_s12, %s1597_s6 }
  0x31   : > { %p1521_p0 = scmp.ne.s32.totalorder %s2291_s15, 0 }
  0x32   : > { %s2292_s24 = sld [smem:[#allocation20_spill]] (!%p1521_p0) }
  0x33   : > { %725 = sbr.rel (%p1521_p0) target bundleno = 62 (0x3e), region = 88 }
  0x38   : > { %v726_v0 = vld [vmem:[%s676_s30] sm:$0xff]  ;;  %vm730_vm0 = vcmask 261120  }
  0x39   : > { %v728_v1 = vld [vmem:[%s2292_s24] sm:$0xff]  ;;  %v727_v2 = vmul.f32 5.656854, %v726_v0 }
  0x3b   : > { %v729_v3 = vadd.f32 %v728_v1, %v727_v2 }
  0x3d   : > { %731 = vst.msk [vmem:[#allocation2] sm:$0xff] %vm730_vm0, %v729_v3 }
  0x3e PF: > { %vm735_vm1 = vcmask 261120   ;;  %v1822_v6 = vmov 32.0   ;;  %v1599_v18 = vld [vmem:[%s2011_s1 + $0x8] sm:$0xff]  ;;  %v1598_v19 = vld [vmem:[%s2011_s1] sm:$0xff]  ;;  %s2293_s1 = scalar_lea.vmem %s2234_s2, %s1994_s21  ;;  %s2294_s23 = sld [smem:[#allocation21_spill]]  ;;  %vm829_vm6 = vcmask 64512  }
  0x3f   : > { %1700 = vrcp.f32 %v1822_v6  ;;  %803 = vmatpush.bf16.msra.mxu0 %v1599_v18  ;;  %v1692_v29 = vld [vmem:[%s2293_s1] ss:$0 sm:$0xff]  ;;  %s2296_s15 = scalar_lea.vmem %s2237_s5, %s1994_s21  ;;  %s1823_s3 = smov 104   ;;  %vm974_vm7 = vcmask 1043456   ;;  %vm1067_vm8 = vcmask 130048   ;;  %vm1069_vm9 = vcmask 195584  }
  0x40   : > { %v1694_v36 = vld [vmem:[%s2296_s15] ss:$0 sm:$0xff]  ;;  %s1824_s25 = smov 120   ;;  %s1825_s24 = smov 112  }
  0x41   : > { %s1826_s6 = smov 96   ;;  %s1827_s30 = smov 64  }
  0x42   : > { %s1828_s1 = smov 8   ;;  %s1829_s29 = smov 24  }
  0x43   : > { %804 = vmatpush.bf16.msra.mxu0 %v1598_v19  ;;  %s1830_s27 = smov 16   ;;  %s2297_s22 = scalar_lea.vmem %s2239_s7, %s1994_s21 }
  0x44   : > { %v2058_v4 = vld [vmem:[#allocation2] sm:$0xff]  ;;  %s2295_s0 = scalar_lea.vmem %s2294_s23, %s1994_s21  ;;  %s2298_s18 = scalar_lea.vmem %s2240_s8, %s1994_s21 }
  0x45   : > { %v736_v5 = vsel %vm735_vm1, %v2058_v4, 0.0  ;;  %v1701_v7 = vpop.eup %1700  ;;  %v1693_v32 = vld [vmem:[%s2295_s0] ss:$0 sm:$0xff] }
  0x46   : > { %737 = vadd.xlane.f32.xlu0 %v736_v5  ;;  %v740_v8 = vmul.f32 32.0, %v1701_v7  ;;  %vm744_vm2 = vweird.f32 %v1701_v7 }
  0x48   : > { %v741_v9 = vsub.f32 1.0, %v740_v8 }
  0x4a   : > { %v742_v10 = vmul.f32 %v1701_v7, %v741_v9 }
  0x4c   : > { %v743_v11 = vadd.f32 %v1701_v7, %v742_v10 }
  0x4e   : > { %v2062_v12 = vsel %vm744_vm2, %v1701_v7, %v743_v11 }
  0xb9   : > { %v738_v13 = vpop.xlane.xlu0 %737 }
  0xba   : > { %v746_v14 = vmul.f32 %v2062_v12, %v738_v13 }
  0xbc   : > { %v747_v15 = vsub.f32 %v2058_v4, %v746_v14 }
  0xbe   : > { %v748_v16 = vmul.f32 %v747_v15, %v747_v15 }
  0xc0   : > { %v749_v17 = vsel %vm735_vm1, %v748_v16, 0.0 }
  0xc1   : > { %750 = vadd.xlane.f32.xlu0 %v749_v17 }
 0x134   : > { %v751_v20 = vpop.xlane.xlu0 %750 }
 0x135   : > { %v752_v21 = vmul.f32 %v751_v20, %v2062_v12 }
 0x137   : > { %v753_v22 = vadd.f32 1e-05, %v752_v21 }
 0x139   : > { %1702 = vrsqrt.f32 %v753_v22  ;;  %vm760_vm4 = vweird.f32 %v753_v22 }
 0x13f   : > { %v1703_v23 = vpop.eup %1702 }
 0x140   : > { %v755_v24 = vmul.f32 %v1703_v23, %v753_v22  ;;  %vm761_vm3 = vweird.f32 %v1703_v23 }
 0x141   : > { %vm762_vm5 = vmor %vm760_vm4, %vm761_vm3 }
 0x142   : > { %v756_v25 = vmul.f32 %v1703_v23, %v755_v24 }
 0x144   : > { %v757_v26 = vmul.f32 0.5, %v756_v25 }
 0x146   : > { %v758_v27 = vsub.f32 1.5, %v757_v26 }
 0x148   : > { %v759_v28 = vmul.f32 %v1703_v23, %v758_v27 }
 0x14a   : > { %v763_v30 = vsel %vm762_vm5, %v1703_v23, %v759_v28 }
 0x14b   : > { %v764_v31 = vmul.f32 %v763_v30, %v747_v15 }
 0x14d   : > { %v768_v33 = vmul.f32 %v1692_v29, %v764_v31 }
 0x14f   : > { %v772_v34 = vadd.f32 %v1693_v32, %v768_v33 }
 0x151   : > { %v773_v35 = vpack.c.bf16 %v772_v34, %v772_v34 }
 0x153   : > { %1530 = vmatmul.msk.bf16.vlgmr.msra.gmra.mxu0 %vm735_vm1, %v773_v35 }
 0x1d0   : > { %v806_v37 = vpop.f32.mrf.mxu0 }
 0x1d1   : > { %v807_v38 = vadd.f32 %v1694_v36, %v806_v37 }
 0x1d3   : > { %817 = vrot.lane.b32.xlu2 %v807_v38, %s1823_s3  ;;  %811 = vrot.lane.b32.xlu1 %v807_v38, %s1824_s25  ;;  %v820_v48 = vpack.c.bf16 %v807_v38, %v807_v38 }
 0x1d5   : > { %v825_v51 = vunpack.c.l.b16 %v820_v48 }
 0x1d7   : > { %v2091_v54 = vpack.c.b16 %v825_v51, %v825_v51 }
 0x1d8   : > { %v808_v39 = vpop.f32.mrf.mxu0 }
 0x1db   : > { %814 = vrot.lane.b32.xlu1 %v807_v38, %s1825_s24 }
 0x22d   : > { %v818_v40 = vpop.permute.xlu2 %817 }
 0x22e   : > { %v823_v41 = vpack.c.bf16 %v818_v40, %v818_v40 }
 0x230   : > { %v898_v42 = vunpack.c.l.b16 %v823_v41 }
 0x232   : > { %v2086_v43 = vpack.c.b16 %v898_v42, %v898_v42 }
 0x234   : > { %900 = vrot.lane.b32.xlu1 %v2086_v43, %s1826_s6 }
 0x245   : > { %v812_v44 = vpop.permute.xlu1 %811 }
 0x246   : > { %v821_v45 = vpack.c.bf16 %v812_v44, %v812_v44 }
 0x248   : > { %v850_v46 = vunpack.c.l.b16 %v821_v45 }
 0x24a   : > { %v851_v47 = vpack.c.b16 %v850_v46, %v850_v46 }
 0x24c   : > { %852 = vrot.lane.b32.xlu2 %v851_v47, %s1826_s6 }
 0x24d   : > { %v815_v49 = vpop.permute.xlu1 %814 }
 0x24e   : > { %v822_v50 = vpack.c.bf16 %v815_v49, %v815_v49 }
 0x250   : > { %v874_v52 = vunpack.c.l.b16 %v822_v50 }
 0x252   : > { %v2089_v53 = vpack.c.b16 %v874_v52, %v874_v52 }
 0x254   : > { %876 = vrot.lane.b32.xlu0 %v2089_v53, %s1826_s6  ;;  %827 = vrot.lane.b32.xlu2 %v2091_v54, %s1826_s6 }
 0x2a6   : > { %v853_v55 = vpop.permute.xlu2 %852  ;;  %v901_v56 = vpop.permute.xlu1 %900 }
 0x2a7   : > { %v858_v57 = vsel %vm829_vm6, %v853_v55, 0  ;;  %v906_v58 = vsel %vm829_vm6, %v901_v56, 0 }
 0x2a8   : > { %867 = vmatpush.bf16.xpose.msra.mxu2 %v858_v57  ;;  %915 = vmatpush.bf16.xpose.msrb.mxu0 %v906_v58 }
 0x2ae   : > { %v828_v59 = vpop.permute.xlu2 %827 }
 0x2af   : > { %1532 = vmatmul.msk.bf16.vlgmr.msra.gmra.mxu2 %vm829_vm6, %v821_v45  ;;  %1534 = vmatmul.msk.bf16.vlgmr.msrb.gmra.mxu0 %vm829_vm6, %v823_v41  ;;  %v834_v60 = vsel %vm829_vm6, %v828_v59, 0 }
 0x2b0   : > { %843 = vmatpush.bf16.xpose.msra.mxu1 %v834_v60 }
 0x2b7   : > { %1531 = vmatmul.msk.bf16.vlgmr.msra.gmra.mxu1 %vm829_vm6, %v820_v48 }
 0x2c6   : > { %v877_v61 = vpop.permute.xlu0 %876 }
 0x2c7   : > { %v882_v62 = vsel %vm829_vm6, %v877_v61, 0 }
 0x2c8   : > { %891 = vmatpush.bf16.xpose.msra.mxu3 %v882_v62 }
 0x2cf   : > { %1533 = vmatmul.msk.bf16.vlgmr.msra.gmra.mxu3 %vm829_vm6, %v822_v50 }
 0x32c   : > { %v917_v63 = vpop.f32.mrf.mxu0 }
 0x32d   : > { %v930_v0 = vsel %vm829_vm6, %v917_v63, -inf }
 0x32e   : > { %931 = vmax.xlane.f32.xlu0 %v930_v0 }
 0x332   : > { %v869_v1 = vpop.f32.mrf.mxu2 }
 0x333   : > { %v924_v2 = vsel %vm829_vm6, %v869_v1, -inf }
 0x334   : > { %925 = vmax.xlane.f32.xlu1 %v924_v2  ;;  %v845_v3 = vpop.f32.mrf.mxu1  ;;  %v919_v5 = vpop.f32.mrf.mxu0  ;;  %v1600_v2 = vld [vmem:[%s2020_s20] sm:$0xff] }
 0x335   : > { %v921_v11 = vsel %vm829_vm6, %v845_v3, -inf }
 0x33a   : > { %v871_v6 = vpop.f32.mrf.mxu2 }
 0x33c   : > { %v847_v7 = vpop.f32.mrf.mxu1 }
 0x342   : > { %991 = vrot.lane.b32.xlu0 %v851_v47, %s1827_s30 }
 0x352   : > { %v893_v8 = vpop.f32.mrf.mxu3 }
 0x353   : > { %v927_v9 = vsel %vm829_vm6, %v893_v8, -inf }
 0x354   : > { %928 = vmax.xlane.f32.xlu2 %v927_v9 }
 0x35a   : > { %v895_v10 = vpop.f32.mrf.mxu3 }
 0x35c   : > { %922 = vmax.xlane.f32.xlu2 %v921_v11  ;;  %v1695_v11 = vld [vmem:[%s2297_s22] ss:$0 sm:$0xff] }
 0x3a1   : > { %v932_v13 = vpop.xlane.xlu0 %931 }
 0x3a2   : > { %v936_v14 = vsub.f32 %v917_v63, %v932_v13 }
 0x3a4   : > { %v943_v15 = vmul.f32 1.442695, %v936_v14 }
 0x3a6   : > { %1704 = vpow2.f32 %v943_v15 }
 0x3a7   : > { %v926_v16 = vpop.xlane.xlu1 %925 }
 0x3a8   : > { %v934_v17 = vsub.f32 %v869_v1, %v926_v16  ;;  %v1601_v1 = vld [vmem:[%s2020_s20 + $0x8] sm:$0xff] }
 0x3aa   : > { %v939_v18 = vmul.f32 1.442695, %v934_v17 }
 0x3ac   : > { %v1705_v19 = vpop.eup %1704  ;;  %1706 = vpow2.f32 %v939_v18 }
 0x3ad   : > { %v954_v20 = vsel %vm829_vm6, %v1705_v19, 0.0 }
 0x3ae   : > { %955 = vadd.xlane.f32.xlu1 %v954_v20 }
 0x3b2   : > { %v1707_v21 = vpop.eup %1706 }
 0x3b3   : > { %v948_v24 = vsel %vm829_vm6, %v1707_v21, 0.0 }
 0x3b4   : > { %v992_v22 = vpop.permute.xlu0 %991 }
 0x3b5   : > { %v997_v23 = vsel %vm974_vm7, %v992_v22, 0 }
 0x3b6   : > { %1006 = vmatpush.bf16.msrb.mxu2 %v997_v23  ;;  %949 = vadd.xlane.f32.xlu1 %v948_v24  ;;  %v1603_v23 = vld [vmem:[%s2037_s19 + $0x8] sm:$0xff]  ;;  %v1602_v24 = vld [vmem:[%s2037_s19] sm:$0xff] }
 0x3ba   : > { %1171 = vmatpush.bf16.msra.mxu2 %v1603_v23 }
 0x3be   : > { %1172 = vmatpush.bf16.msra.mxu2 %v1602_v24 }
 0x3c7   : > { %v929_v25 = vpop.xlane.xlu2 %928 }
 0x3c8   : > { %v935_v26 = vsub.f32 %v893_v8, %v929_v25 }
 0x3ca   : > { %v941_v27 = vmul.f32 1.442695, %v935_v26 }
 0x3cc   : > { %1708 = vpow2.f32 %v941_v27  ;;  %v1610_v27 = vld [vmem:[%s2051_s28 + $0x30] sm:$0xff] }
 0x3cf   : > { %1033 = vrot.lane.b32.xlu1 %v2086_v43, %s1827_s30  ;;  %v923_v28 = vpop.xlane.xlu2 %922 }
 0x3d0   : > { %v933_v29 = vsub.f32 %v845_v3, %v923_v28 }
 0x3d2   : > { %v1709_v30 = vpop.eup %1708  ;;  %v937_v31 = vmul.f32 1.442695, %v933_v29  ;;  %v1609_v29 = vld [vmem:[%s2051_s28 + $0x28] sm:$0xff] }
 0x3d3   : > { %v951_v32 = vsel %vm829_vm6, %v1709_v30, 0.0 }
 0x3d4   : > { %1710 = vpow2.f32 %v937_v31  ;;  %952 = vadd.xlane.f32.xlu2 %v951_v32 }
 0x3da   : > { %v1711_v33 = vpop.eup %1710 }
 0x3db   : > { %v945_v34 = vsel %vm829_vm6, %v1711_v33, 0.0 }
 0x3dc   : > { %946 = vadd.xlane.f32.xlu0 %v945_v34 }
 0x3ec   : > { %1012 = vrot.lane.b32.xlu2 %v2089_v53, %s1827_s30 }
 0x3f4   : > { %969 = vrot.lane.b32.xlu2 %v2091_v54, %s1827_s30 }
 0x421   : > { %v956_v35 = vpop.xlane.xlu1 %955 }
 0x429   : > { %v950_v36 = vpop.xlane.xlu1 %949 }
 0x42a   : > { %1712 = vrcp.f32 %v950_v36  ;;  %v1606_v36 = vld [vmem:[%s2051_s28 + $0x10] sm:$0xff] }
 0x42b   : > { %1714 = vrcp.f32 %v956_v35 }
 0x430   : > { %v1713_v37 = vpop.eup %1712 }
 0x431   : > { %v962_v38 = vmul.f32 %v1713_v37, %v1707_v21  ;;  %v1715_v40 = vpop.eup %1714 }
 0x432   : > { %v964_v41 = vmul.f32 %v1715_v40, %v1705_v19 }
 0x433   : > { %v966_v39 = vpack.c.bf16 %v962_v38, %v962_v38 }
 0x434   : > { %v968_v44 = vpack.c.bf16 %v964_v41, %v964_v41 }
 0x435   : > { %1536 = vmatmul.msk.bf16.vlgmr.msrb.gmra.mxu2 %vm829_vm6, %v966_v39  ;;  %v1696_v39 = vld [vmem:[%s2298_s18] ss:$0 sm:$0xff] }
 0x441   : > { %v1034_v42 = vpop.permute.xlu1 %1033 }
 0x442   : > { %v1039_v43 = vsel %vm974_vm7, %v1034_v42, 0  ;;  %v1697_v42 = vld [vmem:[%s704_s4] ss:$0 sm:$0xff] }
 0x443   : > { %1048 = vmatpush.bf16.msra.mxu0 %v1039_v43 }
 0x446   : > { %1538 = vmatmul.msk.bf16.vlgmr.msra.gmra.mxu0 %vm829_vm6, %v968_v44 }
 0x447   : > { %v953_v45 = vpop.xlane.xlu2 %952 }
 0x448   : > { %1716 = vrcp.f32 %v953_v45 }
 0x44e   : > { %v1717_v46 = vpop.eup %1716 }
 0x44f   : > { %v963_v47 = vmul.f32 %v1717_v46, %v1709_v30  ;;  %v947_v48 = vpop.xlane.xlu0 %946  ;;  %v1013_v49 = vpop.permute.xlu2 %1012  ;;  %v1608_v30 = vld [vmem:[%s2051_s28 + $0x20] sm:$0xff]  ;;  %v1605_v46 = vld [vmem:[%s2051_s28 + $0x8] sm:$0xff] }
 0x450   : > { %1718 = vrcp.f32 %v947_v48  ;;  %v1018_v50 = vsel %vm974_vm7, %v1013_v49, 0  ;;  %v1698_v48 = vld [vmem:[%s712_s17] ss:$0 sm:$0xff] }
 0x451   : > { %1027 = vmatpush.bf16.msrb.mxu3 %v1018_v50  ;;  %v967_v51 = vpack.c.bf16 %v963_v47, %v963_v47  ;;  %v1604_v47 = vld [vmem:[%s2051_s28] sm:$0xff] }
 0x454   : > { %1537 = vmatmul.msk.bf16.vlgmr.msrb.gmra.mxu3 %vm829_vm6, %v967_v51 }
 0x456   : > { %v1719_v52 = vpop.eup %1718 }
 0x457   : > { %v961_v53 = vmul.f32 %v1719_v52, %v1711_v33  ;;  %v970_v54 = vpop.permute.xlu2 %969  ;;  %v1607_v33 = vld [vmem:[%s2051_s28 + $0x18] sm:$0xff] }
 0x458   : > { %v976_v55 = vsel %vm974_vm7, %v970_v54, 0  ;;  %v1699_v54 = vld [vmem:[%s720_s16] ss:$0 sm:$0xff] }
 0x459   : > { %v965_v56 = vpack.c.bf16 %v961_v53, %v961_v53  ;;  %985 = vmatpush.bf16.msrb.mxu1 %v976_v55 }
 0x45c   : > { %1535 = vmatmul.msk.bf16.vlgmr.msrb.gmra.mxu1 %vm829_vm6, %v965_v56 }
 0x45d   : > { %1101 = vmatpush.bf16.msra.mxu1 %v1601_v1 }
 0x461   : > { %1102 = vmatpush.bf16.msra.mxu1 %v1600_v2 }
 0x4b8   : > { %v1008_v57 = vpop.f32.mrf.mxu2 }
 0x4b9   : > { %1055 = vrot.lane.b32.xlu1 %v1008_v57, %s1828_s1 }
 0x4c0   : > { %v1010_v58 = vpop.f32.mrf.mxu2 }
 0x4c3   : > { %v1050_v59 = vpop.f32.mrf.mxu0 }
 0x4c4   : > { %1063 = vrot.lane.b32.xlu1 %v1050_v59, %s1829_s29 }
 0x4cb   : > { %v1052_v60 = vpop.f32.mrf.mxu0 }
 0x4d7   : > { %v1029_v61 = vpop.f32.mrf.mxu3 }
 0x4d8   : > { %1059 = vrot.lane.b32.xlu2 %v1029_v61, %s1830_s27 }
 0x4d9   : > { %v987_v62 = vpop.f32.mrf.mxu1 }
 0x4df   : > { %v1031_v63 = vpop.f32.mrf.mxu3 }
 0x4e1   : > { %v989_v0 = vpop.f32.mrf.mxu1 }
 0x52b   : > { %v1056_v3 = vpop.permute.xlu1 %1055 }
 0x52c   : > { %v1066_v6 = vsel %vm829_vm6, %v987_v62, %v1056_v3 }
 0x532   : > { %v1060_v5 = vpop.permute.xlu2 %1059 }
 0x533   : > { %v1068_v7 = vsel %vm1067_vm8, %v1066_v6, %v1060_v5 }
 0x536   : > { %v1064_v8 = vpop.permute.xlu1 %1063 }
 0x537   : > { %v1070_v9 = vsel %vm1069_vm9, %v1068_v7, %v1064_v8 }
 0x538   : > { %v1071_v10 = vpack.c.bf16 %v1070_v9, %v1070_v9 }
 0x53a   : > { %1547 = vmatmul.msk.bf16.vlgmr.msra.gmra.mxu1 %vm735_vm1, %v1071_v10 }
 0x5b7   : > { %v1104_v13 = vpop.f32.mrf.mxu1 }
 0x5b8   : > { %v1105_v14 = vadd.f32 %v1695_v11, %v1104_v13 }
 0x5ba   : > { %v1108_v15 = vadd.f32 %v1105_v14, %v2058_v4  ;;  %v1611_v4 = vld [vmem:[%s2051_s28 + $0x38] sm:$0xff]  ;;  %s2299_s28 = sld [smem:[#allocation9_spill]] }
 0x5bb   : > { %1248 = vmatpush.bf16.msra.mxu3 %v1611_v4 }
 0x5bc   : > { %v1111_v16 = vsel %vm735_vm1, %v1108_v15, 0.0 }
 0x5bd   : > { %1112 = vadd.xlane.f32.xlu2 %v1111_v16 }
 0x5bf   : > { %v1106_v17 = vpop.f32.mrf.mxu1  ;;  %1249 = vmatpush.bf16.msra.mxu3 %v1610_v27 }
 0x5c0   : > { %p1589_p1 = scmp.ne.s32.totalorder %s2299_s28, 1 }
 0x5c1   : > { %s2300_s16 = sld [smem:[#allocation24_spill]] (!%p1589_p1) }
 0x5c2   : > { %s2301_s29 = sld [smem:[#allocation25_spill]] (!%p1589_p1) }
 0x5c3   : > { %1250 = vmatpush.bf16.msra.mxu3 %v1609_v29 }
 0x5c7   : > { %1251 = vmatpush.bf16.msra.mxu3 %v1608_v30 }
 0x5cb   : > { %1252 = vmatpush.bf16.msra.mxu3 %v1607_v33 }
 0x5cf   : > { %1253 = vmatpush.bf16.msra.mxu3 %v1606_v36 }
 0x5d3   : > { %1254 = vmatpush.bf16.msra.mxu3 %v1605_v46 }
 0x5d7   : > { %1255 = vmatpush.bf16.msra.mxu3 %v1604_v47 }
 0x630   : > { %v1113_v18 = vpop.xlane.xlu2 %1112 }
 0x631   : > { %v1114_v19 = vmul.f32 %v1113_v18, %v2062_v12 }
 0x633   : > { %v1115_v20 = vsub.f32 %v1108_v15, %v1114_v19 }
 0x635   : > { %v1116_v21 = vmul.f32 %v1115_v20, %v1115_v20 }
 0x637   : > { %v1117_v22 = vsel %vm735_vm1, %v1116_v21, 0.0 }
 0x638   : > { %1118 = vadd.xlane.f32.xlu1 %v1117_v22 }
 0x6ab   : > { %v1119_v25 = vpop.xlane.xlu1 %1118 }
 0x6ac   : > { %v1120_v26 = vmul.f32 %v1119_v25, %v2062_v12 }
 0x6ae   : > { %v1121_v28 = vadd.f32 1e-05, %v1120_v26 }
 0x6b0   : > { %1720 = vrsqrt.f32 %v1121_v28  ;;  %vm1128_vm11 = vweird.f32 %v1121_v28 }
 0x6b6   : > { %v1721_v31 = vpop.eup %1720 }
 0x6b7   : > { %v1123_v32 = vmul.f32 %v1721_v31, %v1121_v28  ;;  %vm1129_vm10 = vweird.f32 %v1721_v31 }
 0x6b8   : > { %vm1130_vm12 = vmor %vm1128_vm11, %vm1129_vm10 }
 0x6b9   : > { %v1124_v34 = vmul.f32 %v1721_v31, %v1123_v32 }
 0x6bb   : > { %v1125_v35 = vmul.f32 0.5, %v1124_v34 }
 0x6bd   : > { %v1126_v37 = vsub.f32 1.5, %v1125_v35 }
 0x6bf   : > { %v1127_v38 = vmul.f32 %v1721_v31, %v1126_v37 }
 0x6c1   : > { %v1131_v40 = vsel %vm1130_vm12, %v1721_v31, %v1127_v38 }
 0x6c2   : > { %v1132_v41 = vmul.f32 %v1131_v40, %v1115_v20 }
 0x6c4   : > { %v1136_v43 = vmul.f32 %v1696_v39, %v1132_v41 }
 0x6c6   : > { %v1140_v44 = vadd.f32 %v1697_v42, %v1136_v43 }
 0x6c8   : > { %v1141_v45 = vpack.c.bf16 %v1140_v44, %v1140_v44 }
 0x6ca   : > { %1556 = vmatmul.msk.bf16.vlgmr.msra.gmra.mxu2 %vm735_vm1, %v1141_v45 }
 0x74d   : > { %v1174_v49 = vpop.f32.mrf.mxu2 }
 0x74e   : > { %v1175_v50 = vadd.f32 %v1698_v48, %v1174_v49 }
 0x750   : > { %v1178_v51 = vmax.f32 %v1175_v50, 0.0 }
 0x752   : > { %v1179_v52 = vpack.c.bf16 %v1178_v51, %v1178_v51 }
 0x754   : > { %1256 = vmatmul.bf16.vlgmr.msra.gmra.mxu3 %v1179_v52 }
 0x755   : > { %v1176_v53 = vpop.f32.mrf.mxu2 }
 0x7d7   : > { %v1257_v55 = vpop.f32.mrf.mxu3 }
 0x7d8   : > { %v1258_v56 = vadd.f32 %v1699_v54, %v1257_v55 }
 0x7da   : > { %v1261_v57 = vadd.f32 %v1258_v56, %v1108_v15 }
 0x7db   : > { %1266 = sbr.rel (%p1589_p1) target bundleno = 2285 (0x8ed), region = 92 }
 0x7dc   : > { %1262 = vst.msk [vmem:[#allocation2] sm:$0xff] %vm735_vm1, %v1261_v57 }
 0x7df   : > { %v1259_v58 = vpop.f32.mrf.mxu3 }
 0x7e0   : > { %v1269_v59 = vsel %vm735_vm1, %v1261_v57, 0.0  ;;  %v1722_v11 = vld [vmem:[%s2300_s16] ss:$0 sm:$0xff] }
 0x7e1   : > { %1270 = vadd.xlane.f32.xlu0 %v1269_v59 }
 0x854   : > { %v1271_v60 = vpop.xlane.xlu0 %1270 }
 0x855   : > { %v1272_v61 = vmul.f32 %v1271_v60, %v2062_v12 }
 0x857   : > { %v1273_v62 = vsub.f32 %v1261_v57, %v1272_v61 }
 0x859   : > { %v1274_v63 = vmul.f32 %v1273_v62, %v1273_v62 }
 0x85b   : > { %v1275_v0 = vsel %vm735_vm1, %v1274_v63, 0.0 }
 0x85c   : > { %1276 = vadd.xlane.f32.xlu0 %v1275_v0 }
 0x8cf   : > { %v1277_v1 = vpop.xlane.xlu0 %1276 }
 0x8d0   : > { %v1278_v2 = vmul.f32 %v1277_v1, %v2062_v12  ;;  %v1723_v12 = vld [vmem:[%s2301_s29] ss:$0 sm:$0xff] }
 0x8d2   : > { %v1279_v3 = vadd.f32 1e-05, %v1278_v2 }
 0x8d4   : > { %1724 = vrsqrt.f32 %v1279_v3  ;;  %vm1286_vm14 = vweird.f32 %v1279_v3 }
 0x8da   : > { %v1725_v5 = vpop.eup %1724 }
 0x8db   : > { %v1281_v6 = vmul.f32 %v1725_v5, %v1279_v3  ;;  %vm1287_vm13 = vweird.f32 %v1725_v5 }
 0x8dc   : > { %vm1288_vm15 = vmor %vm1286_vm14, %vm1287_vm13 }
 0x8dd   : > { %v1282_v7 = vmul.f32 %v1725_v5, %v1281_v6 }
 0x8df   : > { %v1283_v8 = vmul.f32 0.5, %v1282_v7 }
 0x8e1   : > { %v1284_v9 = vsub.f32 1.5, %v1283_v8 }
 0x8e3   : > { %v1285_v10 = vmul.f32 %v1725_v5, %v1284_v9 }
 0x8e5   : > { %v1289_v13 = vsel %vm1288_vm15, %v1725_v5, %v1285_v10 }
 0x8e6   : > { %v1290_v14 = vmul.f32 %v1289_v13, %v1273_v62 }
 0x8e8   : > { %v1294_v15 = vmul.f32 %v1722_v11, %v1290_v14 }
 0x8ea   : > { %v1298_v16 = vadd.f32 %v1723_v12, %v1294_v15 }
 0x8ec   : > { %1299 = vst.msk [vmem:[%s672_s14] sm:$0xff] %vm735_vm1, %v1298_v16 }
 0x8ed PF: > { %s2302_s27 = sld [smem:[#allocation10_spill]]  ;;  %s1313_s3 = sshll.u32 %s672_s14, 4  ;;  %s1314_s3 = int_to_ptr.vmem [resolvable:$true] %s1313_s3 }
 0x8ee   : > { %s2303_s23 = sld [smem:[#allocation7_spill]] }
 0x8ef   : > { %s2305_s18 = sld [smem:[#allocation26_spill]] }
 0x8f3   : > { %s1591_s22 = sshll.u32 %s2302_s27, 3 }
 0x8f4   : > { %s2306_s24 = sand.u32 1, %s2303_s23  }
 0x8f5   : > { %s1311_s15 = scalar_lea.hbm %s2305_s18, %s1591_s22  ;;  %s1301_s4 = scalar_lea.sflag [#allocation4], %s2306_s24 }
 0x8f6   : > { %s1315_s25 = sshll.u32 %s1311_s15, 4  ;;  %s1746_s16 = scalar_lea.hbm %s2305_s18, 16  ;;  %s1316_s25 = int_to_ptr.hbm [resolvable:$true] %s1315_s25 }
 0x8f7   : > { %s1740_s6 = sshra.s32 %s1316_s25, 4  ;;  %s1741_s6 = int_to_ptr.hbm [resolvable:$true] %s1740_s6 }
 0x8f8   : > { %s1742_s28 = scalar_lea.hbm %s1741_s6, 8  ;;  %p1747_p6 = scmp.lt.s32.totalorder %s1741_s6, %s2305_s18 }
 0x8f9   : > { %p1743_p2 = scmp.ne.s32.totalorder %s1741_s6, %s1742_s28  ;;  %p1748_p7 = scmp.lt.s32.totalorder %s1746_s16, %s1742_s28 }
 0x8fb   : > { %p1744_p4 = pnand %p1743_p2, %p1965_p3  ;;  %p1749_p8 = por %p1748_p7, %p1747_p6 }
 0x8fd   : > { %p1745_p5 = pneg %p1744_p4 }
 0x8ff   : > { %p1750_p10 = pnand %p1749_p8, %p1745_p5 }
 0x901   : > { %1753 = shalt.err (!%p1750_p10)
}
 0x902   : > { %1612 = dma.vmem_to_hbm [thread:$0]  (%p1965_p3), %s1314_s3, 128, %s1316_s25, %s1301_s4  }
 0x903 PF: > { %s2307_s26 = sld [smem:[#allocation13_spill]] }
 0x904   : > { %s2308_s14 = sld [smem:[#allocation6_spill]] }
 0x909   : > { %p1618_p11 = scmp.ge.s32.totalorder %s2307_s26, 2 }
 0x90a   : > { %s1327_s27 = sand.u32 1, %s2308_s14  }
 0x90b   : > { %p1615_p12 = pnand %p1618_p11, %p1975_p9  ;;  %s1328_s23 = scalar_lea.sflag [#allocation4], %s1327_s27 }
 0x90d   : > { %p1616_p13 = pneg %p1615_p12 }
 0x90f   : > { %1787 = dma.done.wait (%p1616_p13), %s1328_s23, 128  }
 0x910   : > { %1789 = vsyncadd (%p1616_p13), %s1328_s23, 4294967168  ;;  %s29_s28 = sadd.s32 1, %s2307_s26   ;;  %s2310_s21 = sld [smem:[#allocation7_spill]] }
 0x911   : > { %p26_p0 = scmp.ge.s32.totalorder %s29_s28, 6   ;;  %s2311_s22 = sld [smem:[#allocation8_spill]] }
 0x912   : > { %s2312_s23 = sld [smem:[#allocation18_spill]] }
 0x913   : > { %s2313_s24 = sld [smem:[#allocation11_spill]]  ;;  %28 = sbr.rel (!%p26_p0) target bundleno = 14 (0xe), region = 163 }
 0x914   : > { %s2314_s25 = sld [smem:[#allocation12_spill]] }
 0x915   : > { %s2315_s26 = sld [smem:[#allocation14_spill]] }
 0x916   : > { %s2316_s27 = sld [smem:[#allocation16_spill]] }
 0x918   :  { %1334 = vsyncpa [#allocation4], 1 }
 0x919   :  { %1336 = vsyncpa [#allocation4 + $0x1], 1 }

</bundles_post_ra>
